<compile_context>
chip_gen: v6e
topology: v6e:2x2x1
jax: 0.10.0
libtpu: 0.0.40
codegen_flags: <defaults>
</compile_context>

<pallas_src>
import jax
import jax.numpy as jnp
from jax.experimental import pallas as pl
from jax.experimental.pallas import tpu as pltpu


def _round_up(x, m):
    return (x + m - 1) // m * m


def _mlp_softmax_kernel(x_ref, w1_ref, b1_ref, w2_ref, b2_ref, w3_ref, b3_ref,
                        o_ref):
    """Fused 3-layer MLP + softmax over one (TB, D) batch tile.

    Matmul operands are bf16 (MXU), accumulation + elementwise math in f32.
    The class dim is padded to a lane-dense 128; padded logits carry a -1e30
    bias so exp() underflows to 0 and the softmax over real classes is exact.
    """
    x = x_ref[...]                                                  # (TB, D) bf16

    h1 = jnp.dot(x, w1_ref[...], preferred_element_type=jnp.float32)
    h1 = jnp.maximum(h1 + b1_ref[...], 0.0)                         # (TB, 256) f32

    h2 = jnp.dot(h1.astype(jnp.bfloat16), w2_ref[...],
                 preferred_element_type=jnp.float32)
    h2 = jnp.maximum(h2 + b2_ref[...], 0.0)                         # (TB, 128) f32

    logits = jnp.dot(h2.astype(jnp.bfloat16), w3_ref[...],
                     preferred_element_type=jnp.float32)
    logits = logits + b3_ref[...]                                   # (TB, 128) f32

    # numerically-stable softmax over the (padded) class dimension.
    # Exact f32 divide for normalization (approx reciprocal is only
    # ~bf16-accurate and broke the sums-to-1 invariant).
    m = jnp.max(logits, axis=-1, keepdims=True)
    e = jnp.exp(logits - m)
    s = jnp.sum(e, axis=-1, keepdims=True)
    o_ref[...] = (e / s).astype(o_ref.dtype)


def simple_classifier_forward(x_nchw, params):
    """x_nchw: (B, C, H, W) float32.  Returns softmax probs (B, num_classes)."""
    w1, b1, w2, b2, w3, b3 = params
    b = x_nchw.shape[0]
    x_flat = x_nchw.reshape(b, -1)                                  # (B, D) f32
    d = x_flat.shape[1]
    h1, h2, nc = w1.shape[1], w2.shape[1], w3.shape[1]

    # ---- lane/sublane-friendly padding & batch tiling ----------------------
    nc_pad = _round_up(nc, 128)                 # lane-dense output (unmasked vst)
    tb = 256 if b >= 256 else _round_up(max(b, 8), 8)   # >=1 sublane tile of rows
    b_pad = _round_up(b, tb)
    n_tiles = b_pad // tb

    x_p = jnp.zeros((b_pad, d), jnp.bfloat16).at[:b].set(
        x_flat.astype(jnp.bfloat16))
    w1_bf = w1.astype(jnp.bfloat16)
    w2_bf = w2.astype(jnp.bfloat16)
    w3_p = jnp.zeros((h2, nc_pad), jnp.bfloat16).at[:, :nc].set(
        w3.astype(jnp.bfloat16))
    # padded classes get a hugely negative bias -> exp() underflows to 0
    b3_p = jnp.full((1, nc_pad), -1e30, jnp.float32).at[:, :nc].set(b3)

    const = lambda shape: pl.BlockSpec(shape, lambda i: (0,) * len(shape))

    # NOTE: for much larger D (>~4k on v5e scoped VMEM / >~16k on v7x), W1
    # should be K-tiled with an f32 accumulator scratch instead of loaded as a
    # single block; unnecessary at these sizes (W1 bf16 = D*256*2 bytes).
    out = pl.pallas_call(
        _mlp_softmax_kernel,
        out_shape=jax.ShapeDtypeStruct((b_pad, nc_pad), jnp.float32),
        grid=(n_tiles,),
        in_specs=[
            pl.BlockSpec((tb, d), lambda i: (i, 0)),   # x   (batch-tiled)
            const((d, h1)),                            # W1  (VMEM-resident)
            const((1, h1)),                            # b1
            const((h1, h2)),                           # W2
            const((1, h2)),                            # b2
            const((h2, nc_pad)),                       # W3  (lane-dense)
            const((1, nc_pad)),                        # b3
        ],
        out_specs=pl.BlockSpec((tb, nc_pad), lambda i: (i, 0)),
        compiler_params=pltpu.CompilerParams(
            dimension_semantics=("parallel",),  # shard batch tiles on v7x's 2 TCs
        ),
    )(x_p, w1_bf, b1, w2_bf, b2, w3_p, b3_p)

    return out[:b, :nc]


def init_params(key, in_dim, num_classes):
    """Deterministic init mimicking torch.nn.Linear's U(-1/sqrt(fan_in), +)."""
    dims = [(in_dim, 256), (256, 128), (128, num_classes)]
    params = []
    for i, (fan_in, fan_out) in enumerate(dims):
        kw, kb, key = jax.random.split(jax.random.fold_in(key, i), 3)
        bound = 1.0 / jnp.sqrt(fan_in)
        w = jax.random.uniform(kw, (fan_in, fan_out), jnp.float32,
                               -bound, bound)            # stored as (in, out)
        bias = jax.random.uniform(kb, (1, fan_out), jnp.float32, -bound, bound)
        params += [w, bias]
    return tuple(params)


def _reference_forward(x_nchw, params):
    """Pure-JAX f32 reference of the torch module for a correctness check."""
    w1, b1, w2, b2, w3, b3 = params
    x = x_nchw.reshape(x_nchw.shape[0], -1)
    h = jnp.maximum(x @ w1 + b1, 0.0)
    h = jnp.maximum(h @ w2 + b2, 0.0)
    logits = h @ w3 + b3
    return jax.nn.softmax(logits, axis=1)


if __name__ == "__main__":
    # Small shapes consistent with the module: NCHW image input.
    B, C, H, W = 2, 4, 16, 16
    NUM_CLASSES = 10
    D = C * H * W  # 1024

    key = jax.random.PRNGKey(0)
    kx, kp = jax.random.split(key)
    x = jax.random.normal(kx, (B, C, H, W), jnp.float32)
    params = init_params(kp, D, NUM_CLASSES)

    probs = simple_classifier_forward(x, params)
    jax.block_until_ready(probs)

    # sanity: shape, rows sum to 1 (exact f32 normalization), and agreement
    # with an f32 reference (bf16 MXU operands -> loose tolerance).
    assert probs.shape == (B, NUM_CLASSES)
    assert jnp.allclose(jnp.sum(probs, axis=1), 1.0, atol=1e-4)
    ref = _reference_forward(x, params)
    assert jnp.allclose(probs, ref, atol=2e-2)

    print("KERNEL_OK")
</pallas_src>

<mosaic_0001>
module attributes {stable_mosaic.version = 11 : i64} {
  func.func @_mlp_softmax_kernel(%arg0: i32, %arg1: memref<8x1024xbf16, #tpu.memory_space<vmem>>, %arg2: memref<1024x256xbf16, #tpu.memory_space<vmem>>, %arg3: memref<1x256xf32, #tpu.memory_space<vmem>>, %arg4: memref<256x128xbf16, #tpu.memory_space<vmem>>, %arg5: memref<1x128xf32, #tpu.memory_space<vmem>>, %arg6: memref<128x128xbf16, #tpu.memory_space<vmem>>, %arg7: memref<1x128xf32, #tpu.memory_space<vmem>>, %arg8: memref<8x128xf32, #tpu.memory_space<vmem>>) attributes {dimension_semantics = [#tpu.dimension_semantics<parallel>], iteration_bounds = array<i64: 1>, scalar_prefetch = 0 : i64, scratch_operands = 0 : i64, tpu.core_type = #tpu.core_type<tc>, window_params = [{transform_indices = @transform_0, window_bounds = array<i64: 8, 1024>}, {pipeline_mode = #tpu.pipeline_mode<synchronous>, transform_indices = @transform_1, window_bounds = array<i64: 1024, 256>}, {pipeline_mode = #tpu.pipeline_mode<synchronous>, transform_indices = @transform_2, window_bounds = array<i64: 1, 256>}, {pipeline_mode = #tpu.pipeline_mode<synchronous>, transform_indices = @transform_3, window_bounds = array<i64: 256, 128>}, {pipeline_mode = #tpu.pipeline_mode<synchronous>, transform_indices = @transform_4, window_bounds = array<i64: 1, 128>}, {pipeline_mode = #tpu.pipeline_mode<synchronous>, transform_indices = @transform_5, window_bounds = array<i64: 128, 128>}, {pipeline_mode = #tpu.pipeline_mode<synchronous>, transform_indices = @transform_6, window_bounds = array<i64: 1, 128>}, {transform_indices = @transform_7, window_bounds = array<i64: 8, 128>}]} {
    %c0 = arith.constant 0 : index
    %c0_0 = arith.constant 0 : index
    %0 = vector.load %arg1[%c0, %c0_0] : memref<8x1024xbf16, #tpu.memory_space<vmem>>, vector<8x1024xbf16>
    %c0_1 = arith.constant 0 : index
    %c0_2 = arith.constant 0 : index
    %1 = vector.load %arg2[%c0_1, %c0_2] : memref<1024x256xbf16, #tpu.memory_space<vmem>>, vector<1024x256xbf16>
    %cst = arith.constant dense<0.000000e+00> : vector<8x256xf32>
    %2 = tpu.matmul %0, %1, %cst {dimension_numbers = #tpu.dot_dimension_numbers<[1], [0], [0], [1], [0, 0, 1, 1], [], []>} : vector<8x1024xbf16>, vector<1024x256xbf16>, vector<8x256xf32> -> vector<8x256xf32>
    %c0_3 = arith.constant 0 : index
    %c0_4 = arith.constant 0 : index
    %3 = vector.load %arg3[%c0_3, %c0_4] : memref<1x256xf32, #tpu.memory_space<vmem>>, vector<1x256xf32>
    %4 = vector.broadcast %3 : vector<1x256xf32> to vector<8x256xf32>
    %5 = arith.addf %2, %4 : vector<8x256xf32>
    %cst_5 = arith.constant 0.000000e+00 : f32
    %6 = vector.broadcast %cst_5 : f32 to vector<8x256xf32>
    %7 = arith.maximumf %5, %6 : vector<8x256xf32>
    %8 = arith.truncf %7 : vector<8x256xf32> to vector<8x256xbf16>
    %c0_6 = arith.constant 0 : index
    %c0_7 = arith.constant 0 : index
    %9 = vector.load %arg4[%c0_6, %c0_7] : memref<256x128xbf16, #tpu.memory_space<vmem>>, vector<256x128xbf16>
    %cst_8 = arith.constant dense<0.000000e+00> : vector<8x128xf32>
    %10 = tpu.matmul %8, %9, %cst_8 {dimension_numbers = #tpu.dot_dimension_numbers<[1], [0], [0], [1], [0, 0, 1, 1], [], []>} : vector<8x256xbf16>, vector<256x128xbf16>, vector<8x128xf32> -> vector<8x128xf32>
    %c0_9 = arith.constant 0 : index
    %c0_10 = arith.constant 0 : index
    %11 = vector.load %arg5[%c0_9, %c0_10] : memref<1x128xf32, #tpu.memory_space<vmem>>, vector<1x128xf32>
    %12 = vector.broadcast %11 : vector<1x128xf32> to vector<8x128xf32>
    %13 = arith.addf %10, %12 : vector<8x128xf32>
    %cst_11 = arith.constant 0.000000e+00 : f32
    %14 = vector.broadcast %cst_11 : f32 to vector<8x128xf32>
    %15 = arith.maximumf %13, %14 : vector<8x128xf32>
    %16 = arith.truncf %15 : vector<8x128xf32> to vector<8x128xbf16>
    %c0_12 = arith.constant 0 : index
    %c0_13 = arith.constant 0 : index
    %17 = vector.load %arg6[%c0_12, %c0_13] : memref<128x128xbf16, #tpu.memory_space<vmem>>, vector<128x128xbf16>
    %cst_14 = arith.constant dense<0.000000e+00> : vector<8x128xf32>
    %18 = tpu.matmul %16, %17, %cst_14 {dimension_numbers = #tpu.dot_dimension_numbers<[1], [0], [0], [1], [0, 0, 1, 1], [], []>} : vector<8x128xbf16>, vector<128x128xbf16>, vector<8x128xf32> -> vector<8x128xf32>
    %c0_15 = arith.constant 0 : index
    %c0_16 = arith.constant 0 : index
    %19 = vector.load %arg7[%c0_15, %c0_16] : memref<1x128xf32, #tpu.memory_space<vmem>>, vector<1x128xf32>
    %20 = vector.broadcast %19 : vector<1x128xf32> to vector<8x128xf32>
    %21 = arith.addf %18, %20 : vector<8x128xf32>
    %cst_17 = arith.constant dense<0xFF800000> : vector<8xf32>
    %22 = vector.multi_reduction <maximumf>, %21, %cst_17 [1] : vector<8x128xf32> to vector<8xf32>
    %23 = vector.shape_cast %22 : vector<8xf32> to vector<8x1xf32>
    %24 = vector.broadcast %23 : vector<8x1xf32> to vector<8x128xf32>
    %25 = arith.subf %21, %24 : vector<8x128xf32>
    %26 = math.exp %25 : vector<8x128xf32>
    %cst_18 = arith.constant dense<0.000000e+00> : vector<8xf32>
    %27 = vector.multi_reduction <add>, %26, %cst_18 [1] : vector<8x128xf32> to vector<8xf32>
    %28 = vector.shape_cast %27 : vector<8xf32> to vector<8x1xf32>
    %29 = vector.broadcast %28 : vector<8x1xf32> to vector<8x128xf32>
    %30 = arith.divf %26, %29 : vector<8x128xf32>
    %c0_19 = arith.constant 0 : index
    %c0_20 = arith.constant 0 : index
    %31 = vector.load %arg8[%c0_19, %c0_20] : memref<8x128xf32, #tpu.memory_space<vmem>>, vector<8x128xf32>
    tpu.vector_store %arg8[%c0_19, %c0_20], %30 {strides = array<i32>} : memref<8x128xf32, #tpu.memory_space<vmem>>, vector<8x128xf32>,
    return
  }
  func.func @transform_0(%arg0: i32) -> (i32, i32) {
    %c0_i32 = arith.constant 0 : i32
    %c0_i32_0 = arith.constant 0 : i32
    return %arg0, %c0_i32 : i32, i32
  }
  func.func @transform_1(%arg0: i32) -> (i32, i32) {
    %c0_i32 = arith.constant 0 : i32
    %c0_i32_0 = arith.constant 0 : i32
    %c0_i32_1 = arith.constant 0 : i32
    return %c0_i32, %c0_i32_0 : i32, i32
  }
  func.func @transform_2(%arg0: i32) -> (i32, i32) {
    %c0_i32 = arith.constant 0 : i32
    %c0_i32_0 = arith.constant 0 : i32
    %c0_i32_1 = arith.constant 0 : i32
    return %c0_i32, %c0_i32_0 : i32, i32
  }
  func.func @transform_3(%arg0: i32) -> (i32, i32) {
    %c0_i32 = arith.constant 0 : i32
    %c0_i32_0 = arith.constant 0 : i32
    %c0_i32_1 = arith.constant 0 : i32
    return %c0_i32, %c0_i32_0 : i32, i32
  }
  func.func @transform_4(%arg0: i32) -> (i32, i32) {
    %c0_i32 = arith.constant 0 : i32
    %c0_i32_0 = arith.constant 0 : i32
    %c0_i32_1 = arith.constant 0 : i32
    return %c0_i32, %c0_i32_0 : i32, i32
  }
  func.func @transform_5(%arg0: i32) -> (i32, i32) {
    %c0_i32 = arith.constant 0 : i32
    %c0_i32_0 = arith.constant 0 : i32
    %c0_i32_1 = arith.constant 0 : i32
    return %c0_i32, %c0_i32_0 : i32, i32
  }
  func.func @transform_6(%arg0: i32) -> (i32, i32) {
    %c0_i32 = arith.constant 0 : i32
    %c0_i32_0 = arith.constant 0 : i32
    %c0_i32_1 = arith.constant 0 : i32
    return %c0_i32, %c0_i32_0 : i32, i32
  }
  func.func @transform_7(%arg0: i32) -> (i32, i32) {
    %c0_i32 = arith.constant 0 : i32
    %c0_i32_0 = arith.constant 0 : i32
    return %arg0, %c0_i32 : i32, i32
  }
}

</mosaic_0001>

<bundles_post_ra>
// kernel: tpu_custom_call.1
= control target key start
LH: loop header
LB: loop body
LE: loop exit
PB: predicated region body
PF: predicated region fallthrough
CT: control target
= control target key end

     0   :  { %12 = vsyncpa [#allocation3], 0  ;;  %s2023_s0 = inlined_call_operand.hbm [shape: bf16[8,1024], index: 0, kind: input, shape index: {}]   ;;  %s2024_s1 = inlined_call_operand.hbm [shape: bf16[1024,256], index: 1, kind: input, shape index: {}]   ;;  %s2025_s2 = inlined_call_operand.vmem [shape: f32[1,256], index: 2, kind: input, shape index: {}]   ;;  %s2026_s3 = inlined_call_operand.hbm [shape: bf16[256,128], index: 3, kind: input, shape index: {}]   ;;  %s2027_s4 = inlined_call_operand.vmem [shape: f32[1,128], index: 4, kind: input, shape index: {}]   ;;  %s2028_s5 = inlined_call_operand.hbm [shape: bf16[128,128], index: 5, kind: input, shape index: {}]   ;;  %s2029_s6 = inlined_call_operand.vmem [shape: f32[1,128], index: 6, kind: input, shape index: {}]   ;;  %s2030_s7 = inlined_call_operand.hbm [shape: f32[8,128], index: 7, kind: output, shape index: {}]  }
   0x1   :  { %13 = vsyncpa [#allocation6], 0 }
   0x2   :  { %14 = vsyncpa [#allocation9], 0 }
   0x3   :  { %15 = vsyncpa [#allocation4], 0  ;;  %s1936_s24 = smov [#allocation5]  }
   0x4   :  { %s31_s25 = sshll.u32 %s1936_s24, 4  ;;  %s32_s25 = int_to_ptr.vmem [resolvable:$true] %s31_s25 }
   0x5   :  { %s1836_s26 = scalar_lea.vmem %s32_s25, 16384  ;;  %p1841_p1 = scmp.lt.s32.totalorder %s32_s25, %s32_s25 }
   0x6   :  { %p1837_p0 = scmp.ne.s32.totalorder %s32_s25, %s1836_s26  ;;  %p1842_p2 = scmp.lt.s32.totalorder %s1836_s26, %s1836_s26 }
   0x8   :  { %p1843_p3 = por %p1842_p2, %p1841_p1 }
   0xa   :  { %p1844_p4 = pnand %p1843_p3, %p1837_p0 }
   0xc   :  { %1847 = shalt.err (!%p1844_p4)
}
   0xd   :  { %s1937_s27 = smov 128   ;;  %s1938_s28 = smov 8  }
   0xe   :  { %37 = dma.hbm_to_vmem [thread:$0]  %s2024_s1, 16384, %s32_s25, [#allocation6], %s1937_s27, %s1937_s27, %s1938_s28  }
   0xf   :  { %s1939_s8 = smov [#allocation2]   ;;  %s1940_s10 = smov [#allocation7]  }
  0x10   :  { %s22_s9 = sshll.u32 %s1939_s8, 4  ;;  %s45_s11 = sshll.u32 %s1940_s10, 4  ;;  %s23_s9 = int_to_ptr.vmem [resolvable:$true] %s22_s9  ;;  %s46_s11 = int_to_ptr.vmem [resolvable:$true] %s45_s11 }
  0x11   :  { %s1856_s12 = scalar_lea.vmem %s23_s9, 512  ;;  %p1861_p6 = scmp.lt.s32.totalorder %s23_s9, %s23_s9 }
  0x12   :  { %p1857_p5 = scmp.ne.s32.totalorder %s23_s9, %s1856_s12  ;;  %p1862_p7 = scmp.lt.s32.totalorder %s1856_s12, %s1856_s12 }
  0x14   :  { %p1863_p8 = por %p1862_p7, %p1861_p6 }
  0x16   :  { %p1864_p9 = pnand %p1863_p8, %p1857_p5 }
  0x18   :  { %1867 = shalt.err (!%p1864_p9)
}
  0x19   :  { %25 = dma.hbm_to_vmem [thread:$0]  %s2023_s0, 512, %s23_s9, [#allocation3]  }
  0x1a   :  { %s1876_s15 = scalar_lea.vmem %s46_s11, 2048  ;;  %p1881_p11 = scmp.lt.s32.totalorder %s46_s11, %s46_s11 }
  0x1b   :  { %p1877_p10 = scmp.ne.s32.totalorder %s46_s11, %s1876_s15  ;;  %p1882_p12 = scmp.lt.s32.totalorder %s1876_s15, %s1876_s15 }
  0x1d   :  { %p1883_p13 = por %p1882_p12, %p1881_p11 }
  0x1f   :  { %p1884_p0 = pnand %p1883_p13, %p1877_p10 }
  0x21   :  { %1887 = shalt.err (!%p1884_p0)
}
  0x22   :  { %s1941_s1 = smov 64   ;;  %s1942_s16 = smov 4  }
  0x23   :  { %51 = dma.hbm_to_vmem [thread:$0]  %s2026_s3, 2048, %s46_s11, [#allocation6], %s1941_s1, %s1941_s1, %s1942_s16  }
  0x24   :  { %s1943_s19 = smov [#allocation8]  }
  0x25   :  { %s59_s20 = sshll.u32 %s1943_s19, 4  ;;  %s60_s20 = int_to_ptr.vmem [resolvable:$true] %s59_s20 }
  0x26   :  { %s1896_s21 = scalar_lea.vmem %s60_s20, 1024  ;;  %p1901_p2 = scmp.lt.s32.totalorder %s60_s20, %s60_s20 }
  0x27   :  { %p1897_p1 = scmp.ne.s32.totalorder %s60_s20, %s1896_s21  ;;  %p1902_p3 = scmp.lt.s32.totalorder %s1896_s21, %s1896_s21 }
  0x29   :  { %p1903_p4 = por %p1902_p3, %p1901_p2 }
  0x2b   :  { %p1904_p5 = pnand %p1903_p4, %p1897_p1 }
  0x2d   :  { %1907 = shalt.err (!%p1904_p5)
}
  0x2e   :  { %65 = dma.hbm_to_vmem [thread:$0]  %s2028_s5, 1024, %s60_s20, [#allocation9], %s1941_s1, %s1941_s1, %s1942_s16  }
  0x2f   :  { %1928 = dma.done.wait [#allocation3], 512  }
  0x30   :  { %1929 = vsyncadd [#allocation3], 4294966784 }
  0x31   :  { %1930 = dma.done.wait [#allocation6], 18432  }
  0x32   :  { %1931 = vsyncadd [#allocation6], 4294948864 }
  0x33   :  { %1932 = dma.done.wait [#allocation9], 1024  }
  0x34   :  { %1933 = vsyncadd [#allocation9], 4294966272  ;;  %v1600_v0 = vld [vmem:[#allocation5 + $0x74] ss:$8 sps:$4 sm:$0xff]   ;;  %v1604_v2 = vld [vmem:[#allocation5 + $0x70] ss:$8 sps:$4 sm:$0xff]  }
  0x35   :  { %v1602_v1 = vld [vmem:[#allocation5 + $0x174] ss:$8 sps:$4 sm:$0xff]   ;;  %893 = vmatprep.subr.bf16.mxu0 %v1600_v0  ;;  %v1605_v3 = vld [vmem:[#allocation5 + $0x170] ss:$8 sps:$4 sm:$0xff]   ;;  %v1606_v4 = vld [vmem:[#allocation5 + $0x64] ss:$8 sps:$4 sm:$0xff]  }
  0x36   :  { %934 = vmatprep.subr.bf16.mxu1 %v1602_v1  ;;  %894 = vmatpush1.bf16.msra.mxu0 %v1604_v2  ;;  %v1608_v5 = vld [vmem:[#allocation5 + $0x164] ss:$8 sps:$4 sm:$0xff]   ;;  %v1610_v6 = vld [vmem:[#allocation5 + $0x60] ss:$8 sps:$4 sm:$0xff]   ;;  %v1612_v8 = vld [vmem:[#allocation5 + $0x54] ss:$8 sps:$4 sm:$0xff]  }
  0x37   :  { %935 = vmatpush1.bf16.msra.mxu1 %v1605_v3  ;;  %895 = vmatprep.subr.bf16.mxu0 %v1606_v4  ;;  %v1611_v7 = vld [vmem:[#allocation5 + $0x160] ss:$8 sps:$4 sm:$0xff]   ;;  %v1614_v9 = vld [vmem:[#allocation5 + $0x154] ss:$8 sps:$4 sm:$0xff]   ;;  %v1616_v10 = vld [vmem:[#allocation5 + $0x50] ss:$8 sps:$4 sm:$0xff]  }
  0x38   :  { %936 = vmatprep.subr.bf16.mxu1 %v1608_v5  ;;  %v1617_v11 = vld [vmem:[#allocation5 + $0x150] ss:$8 sps:$4 sm:$0xff]   ;;  %v1618_v12 = vld [vmem:[#allocation5 + $0x44] ss:$8 sps:$4 sm:$0xff]   ;;  %v1622_v14 = vld [vmem:[#allocation5 + $0x40] ss:$8 sps:$4 sm:$0xff]  }
  0x39   :  { %v1620_v13 = vld [vmem:[#allocation5 + $0x144] ss:$8 sps:$4 sm:$0xff]   ;;  %v1623_v15 = vld [vmem:[#allocation5 + $0x140] ss:$8 sps:$4 sm:$0xff]   ;;  %v1624_v16 = vld [vmem:[#allocation5 + $0x34] ss:$8 sps:$4 sm:$0xff]  }
  0x3a   :  { %896 = vmatpush1.bf16.msra.mxu0 %v1610_v6  ;;  %v1626_v17 = vld [vmem:[#allocation5 + $0x134] ss:$8 sps:$4 sm:$0xff]   ;;  %v1628_v18 = vld [vmem:[#allocation5 + $0x30] ss:$8 sps:$4 sm:$0xff]   ;;  %v1630_v20 = vld [vmem:[#allocation5 + $0x24] ss:$8 sps:$4 sm:$0xff]  }
  0x3b   :  { %937 = vmatpush1.bf16.msra.mxu1 %v1611_v7  ;;  %897 = vmatprep.subr.bf16.mxu0 %v1612_v8  ;;  %v1629_v19 = vld [vmem:[#allocation5 + $0x130] ss:$8 sps:$4 sm:$0xff]   ;;  %v1632_v21 = vld [vmem:[#allocation5 + $0x124] ss:$8 sps:$4 sm:$0xff]   ;;  %v1634_v22 = vld [vmem:[#allocation5 + $0x20] ss:$8 sps:$4 sm:$0xff]  }
  0x3c   :  { %938 = vmatprep.subr.bf16.mxu1 %v1614_v9  ;;  %v1635_v23 = vld [vmem:[#allocation5 + $0x120] ss:$8 sps:$4 sm:$0xff]   ;;  %v1636_v24 = vld [vmem:[#allocation5 + $0x14] ss:$8 sps:$4 sm:$0xff]   ;;  %v1640_v26 = vld [vmem:[#allocation5 + $0x10] ss:$8 sps:$4 sm:$0xff]  }
  0x3d   :  { %v1638_v25 = vld [vmem:[#allocation5 + $0x114] ss:$8 sps:$4 sm:$0xff]   ;;  %v1641_v27 = vld [vmem:[#allocation5 + $0x110] ss:$8 sps:$4 sm:$0xff]   ;;  %v1642_v28 = vld [vmem:[#allocation5 + $0x4] ss:$8 sps:$4 sm:$0xff]  }
  0x3e   :  { %898 = vmatpush1.bf16.msra.mxu0 %v1616_v10  ;;  %v1644_v29 = vld [vmem:[#allocation5 + $0x104] ss:$8 sps:$4 sm:$0xff]   ;;  %v1646_v30 = vld [vmem:[#allocation5] ss:$8 sps:$4 sm:$0xff]   ;;  %v1648_v32 = vld [vmem:[#allocation5 + $0xf4] ss:$8 sps:$4 sm:$0xff]  }
  0x3f   :  { %939 = vmatpush1.bf16.msra.mxu1 %v1617_v11  ;;  %899 = vmatprep.subr.bf16.mxu0 %v1618_v12  ;;  %v1647_v31 = vld [vmem:[#allocation5 + $0x100] ss:$8 sps:$4 sm:$0xff]   ;;  %v1650_v33 = vld [vmem:[#allocation5 + $0x1f4] ss:$8 sps:$4 sm:$0xff]   ;;  %v1652_v34 = vld [vmem:[#allocation5 + $0xf0] ss:$8 sps:$4 sm:$0xff]  }
  0x40   :  { %940 = vmatprep.subr.bf16.mxu1 %v1620_v13  ;;  %v1653_v35 = vld [vmem:[#allocation5 + $0x1f0] ss:$8 sps:$4 sm:$0xff]   ;;  %v1654_v36 = vld [vmem:[#allocation5 + $0xe4] ss:$8 sps:$4 sm:$0xff]   ;;  %v1658_v38 = vld [vmem:[#allocation5 + $0xe0] ss:$8 sps:$4 sm:$0xff]  }
  0x41   :  { %v1656_v37 = vld [vmem:[#allocation5 + $0x1e4] ss:$8 sps:$4 sm:$0xff]   ;;  %v1659_v39 = vld [vmem:[#allocation5 + $0x1e0] ss:$8 sps:$4 sm:$0xff]   ;;  %v1660_v40 = vld [vmem:[#allocation5 + $0xd4] ss:$8 sps:$4 sm:$0xff]  }
  0x42   :  { %900 = vmatpush1.bf16.msra.mxu0 %v1622_v14  ;;  %v1662_v41 = vld [vmem:[#allocation5 + $0x1d4] ss:$8 sps:$4 sm:$0xff]   ;;  %v1664_v42 = vld [vmem:[#allocation5 + $0xd0] ss:$8 sps:$4 sm:$0xff]   ;;  %v1666_v44 = vld [vmem:[#allocation5 + $0xc4] ss:$8 sps:$4 sm:$0xff]  }
  0x43   :  { %941 = vmatpush1.bf16.msra.mxu1 %v1623_v15  ;;  %901 = vmatprep.subr.bf16.mxu0 %v1624_v16  ;;  %v1665_v43 = vld [vmem:[#allocation5 + $0x1d0] ss:$8 sps:$4 sm:$0xff]   ;;  %v1668_v45 = vld [vmem:[#allocation5 + $0x1c4] ss:$8 sps:$4 sm:$0xff]   ;;  %v1670_v49 = vld [vmem:[#allocation5 + $0xc0] ss:$8 sps:$4 sm:$0xff]  }
  0x44   :  { %942 = vmatprep.subr.bf16.mxu1 %v1626_v17  ;;  %v81_v46 = vld [vmem:[#allocation2] sm:$0xff]  ;;  %v82_v48 = vld [vmem:[#allocation2 + $0x8] sm:$0xff]  ;;  %v1672_v52 = vld [vmem:[#allocation5 + $0xb4] ss:$8 sps:$4 sm:$0xff]   ;;  %vm1945_vm0 = vmmov 0  }
  0x45   :  { %v1377_v47 = vcombine.high %v81_v46, %v81_v46  ;;  %v1671_v50 = vld [vmem:[#allocation5 + $0x1c0] ss:$8 sps:$4 sm:$0xff]   ;;  %v1379_v51 = vcombine.high %v82_v48, %v82_v48  ;;  %v1674_v53 = vld [vmem:[#allocation5 + $0x1b4] ss:$8 sps:$4 sm:$0xff]   ;;  %v1676_v54 = vld [vmem:[#allocation5 + $0xb0] ss:$8 sps:$4 sm:$0xff]   ;;  %v1376_v6 = vcombine.low %v81_v46, %v81_v46  ;;  %v1378_v7 = vcombine.low %v82_v48, %v82_v48 }
  0x46   :  { %902 = vmatpush1.bf16.msra.mxu0 %v1628_v18  ;;  %v1677_v55 = vld [vmem:[#allocation5 + $0x1b0] ss:$8 sps:$4 sm:$0xff]   ;;  %v1678_v56 = vld [vmem:[#allocation5 + $0xa4] ss:$8 sps:$4 sm:$0xff]   ;;  %v1682_v58 = vld [vmem:[#allocation5 + $0xa0] ss:$8 sps:$4 sm:$0xff]  }
  0x47   :  { %943 = vmatpush1.bf16.msra.mxu1 %v1629_v19  ;;  %903 = vmatprep.subr.bf16.mxu0 %v1630_v20  ;;  %v1680_v57 = vld [vmem:[#allocation5 + $0x1a4] ss:$8 sps:$4 sm:$0xff]   ;;  %v1683_v59 = vld [vmem:[#allocation5 + $0x1a0] ss:$8 sps:$4 sm:$0xff]   ;;  %v1684_v60 = vld [vmem:[#allocation5 + $0x94] ss:$8 sps:$4 sm:$0xff]  }
  0x48   :  { %944 = vmatprep.subr.bf16.mxu1 %v1632_v21  ;;  %925 = vmatprep.mubr.bf16.mxu0 %v1377_v47  ;;  %v1686_v61 = vld [vmem:[#allocation5 + $0x194] ss:$8 sps:$4 sm:$0xff]   ;;  %v1688_v62 = vld [vmem:[#allocation5 + $0x90] ss:$8 sps:$4 sm:$0xff]   ;;  %v1690_v0 = vld [vmem:[#allocation5 + $0x84] ss:$8 sps:$4 sm:$0xff]  }
  0x49   :  { %966 = vmatprep.mubr.bf16.mxu1 %v1379_v51  ;;  %v1689_v63 = vld [vmem:[#allocation5 + $0x190] ss:$8 sps:$4 sm:$0xff]   ;;  %v1692_v1 = vld [vmem:[#allocation5 + $0x184] ss:$8 sps:$4 sm:$0xff]   ;;  %v1694_v2 = vld [vmem:[#allocation5 + $0x80] ss:$8 sps:$4 sm:$0xff]  }
  0x4a   :  { %904 = vmatpush1.bf16.msra.mxu0 %v1634_v22  ;;  %v1695_v3 = vld [vmem:[#allocation5 + $0x180] ss:$8 sps:$4 sm:$0xff]   ;;  %v1702_v4 = vld [vmem:[#allocation5 + $0x274] ss:$8 sps:$4 sm:$0xff]   ;;  %v1700_v8 = vld [vmem:[#allocation5 + $0x270] ss:$8 sps:$4 sm:$0xff]  }
  0x4b   :  { %945 = vmatpush1.bf16.msra.mxu1 %v1635_v23  ;;  %905 = vmatprep.subr.bf16.mxu0 %v1636_v24  ;;  %v1705_v5 = vld [vmem:[#allocation5 + $0x374] ss:$8 sps:$4 sm:$0xff]   ;;  %v1703_v9 = vld [vmem:[#allocation5 + $0x370] ss:$8 sps:$4 sm:$0xff]   ;;  %v1708_v10 = vld [vmem:[#allocation5 + $0x264] ss:$8 sps:$4 sm:$0xff]  }
  0x4c   :  { %946 = vmatprep.subr.bf16.mxu1 %v1638_v25  ;;  %v1711_v11 = vld [vmem:[#allocation5 + $0x364] ss:$8 sps:$4 sm:$0xff]   ;;  %v1706_v12 = vld [vmem:[#allocation5 + $0x260] ss:$8 sps:$4 sm:$0xff]   ;;  %v1714_v14 = vld [vmem:[#allocation5 + $0x254] ss:$8 sps:$4 sm:$0xff]  }
  0x4d   :  { %v1709_v13 = vld [vmem:[#allocation5 + $0x360] ss:$8 sps:$4 sm:$0xff]   ;;  %v1717_v15 = vld [vmem:[#allocation5 + $0x354] ss:$8 sps:$4 sm:$0xff]   ;;  %v1712_v16 = vld [vmem:[#allocation5 + $0x250] ss:$8 sps:$4 sm:$0xff]  }
  0x4e   :  { %906 = vmatpush1.bf16.msra.mxu0 %v1640_v26  ;;  %v1715_v17 = vld [vmem:[#allocation5 + $0x350] ss:$8 sps:$4 sm:$0xff]   ;;  %v1720_v18 = vld [vmem:[#allocation5 + $0x244] ss:$8 sps:$4 sm:$0xff]   ;;  %v1718_v20 = vld [vmem:[#allocation5 + $0x240] ss:$8 sps:$4 sm:$0xff]  }
  0x4f   :  { %947 = vmatpush1.bf16.msra.mxu1 %v1641_v27  ;;  %907 = vmatprep.subr.bf16.mxu0 %v1642_v28  ;;  %v1723_v19 = vld [vmem:[#allocation5 + $0x344] ss:$8 sps:$4 sm:$0xff]   ;;  %v1721_v21 = vld [vmem:[#allocation5 + $0x340] ss:$8 sps:$4 sm:$0xff]   ;;  %v1726_v22 = vld [vmem:[#allocation5 + $0x234] ss:$8 sps:$4 sm:$0xff]  }
  0x50   :  { %948 = vmatprep.subr.bf16.mxu1 %v1644_v29  ;;  %v1729_v23 = vld [vmem:[#allocation5 + $0x334] ss:$8 sps:$4 sm:$0xff]   ;;  %v1724_v24 = vld [vmem:[#allocation5 + $0x230] ss:$8 sps:$4 sm:$0xff]   ;;  %v1732_v26 = vld [vmem:[#allocation5 + $0x224] ss:$8 sps:$4 sm:$0xff]  }
  0x51   :  { %v1727_v25 = vld [vmem:[#allocation5 + $0x330] ss:$8 sps:$4 sm:$0xff]   ;;  %v1735_v27 = vld [vmem:[#allocation5 + $0x324] ss:$8 sps:$4 sm:$0xff]   ;;  %v1730_v28 = vld [vmem:[#allocation5 + $0x220] ss:$8 sps:$4 sm:$0xff]  }
  0x52   :  { %908 = vmatpush1.bf16.msra.mxu0 %v1646_v30  ;;  %v1733_v29 = vld [vmem:[#allocation5 + $0x320] ss:$8 sps:$4 sm:$0xff]   ;;  %v1738_v30 = vld [vmem:[#allocation5 + $0x214] ss:$8 sps:$4 sm:$0xff]   ;;  %v1756_v46 = vld [vmem:[#allocation5 + $0x2e4] ss:$8 sps:$4 sm:$0xff]  }
  0x53   :  { %949 = vmatpush1.bf16.msra.mxu1 %v1647_v31  ;;  %909 = vmatprep.subr.bf16.mxu0 %v1648_v32  ;;  %v1741_v31 = vld [vmem:[#allocation5 + $0x314] ss:$8 sps:$4 sm:$0xff]   ;;  %v1736_v32 = vld [vmem:[#allocation5 + $0x210] ss:$8 sps:$4 sm:$0xff]   ;;  %v1759_v47 = vld [vmem:[#allocation5 + $0x3e4] ss:$8 sps:$4 sm:$0xff]  }
  0x54   :  { %950 = vmatprep.subr.bf16.mxu1 %v1650_v33  ;;  %v1739_v33 = vld [vmem:[#allocation5 + $0x310] ss:$8 sps:$4 sm:$0xff]   ;;  %v1754_v48 = vld [vmem:[#allocation5 + $0x2e0] ss:$8 sps:$4 sm:$0xff]   ;;  %v1765_v51 = vld [vmem:[#allocation5 + $0x3d4] ss:$8 sps:$4 sm:$0xff]  }
  0x56   :  { %910 = vmatpush2.bf16.msra.mxu0 %v1652_v34  ;;  %v1999_v34 = vld [vmem:[#allocation2 + $0x10] sm:$0xff] }
  0x57   :  { %951 = vmatpush2.bf16.msra.mxu1 %v1653_v35  ;;  %911 = vmatprep.subr.bf16.mxu0 %v1654_v36  ;;  %v2001_v35 = vld [vmem:[#allocation2 + $0x18] sm:$0xff]  ;;  %v1744_v36 = vld [vmem:[#allocation5 + $0x204] ss:$8 sps:$4 sm:$0xff]  }
  0x58   :  { %952 = vmatprep.subr.bf16.mxu1 %v1656_v37  ;;  %v1747_v37 = vld [vmem:[#allocation5 + $0x304] ss:$8 sps:$4 sm:$0xff]  }
  0x5a   :  { %912 = vmatpush2.bf16.msra.mxu0 %v1658_v38  ;;  %v1381_v38 = vcombine.high %v1999_v34, %v1999_v34 }
  0x5b   :  { %953 = vmatpush2.bf16.msra.mxu1 %v1659_v39  ;;  %913 = vmatprep.subr.bf16.mxu0 %v1660_v40  ;;  %v1383_v39 = vcombine.high %v2001_v35, %v2001_v35  ;;  %v1742_v40 = vld [vmem:[#allocation5 + $0x200] ss:$8 sps:$4 sm:$0xff]  }
  0x5c   :  { %954 = vmatprep.subr.bf16.mxu1 %v1662_v41  ;;  %v1745_v41 = vld [vmem:[#allocation5 + $0x300] ss:$8 sps:$4 sm:$0xff]  }
  0x5e   :  { %914 = vmatpush2.bf16.msra.mxu0 %v1664_v42  ;;  %v1750_v42 = vld [vmem:[#allocation5 + $0x2f4] ss:$8 sps:$4 sm:$0xff]  }
  0x5f   :  { %955 = vmatpush2.bf16.msra.mxu1 %v1665_v43  ;;  %915 = vmatprep.subr.bf16.mxu0 %v1666_v44  ;;  %v1753_v43 = vld [vmem:[#allocation5 + $0x3f4] ss:$8 sps:$4 sm:$0xff]   ;;  %v1748_v44 = vld [vmem:[#allocation5 + $0x2f0] ss:$8 sps:$4 sm:$0xff]  }
  0x60   :  { %956 = vmatprep.subr.bf16.mxu1 %v1668_v45  ;;  %v1751_v45 = vld [vmem:[#allocation5 + $0x3f0] ss:$8 sps:$4 sm:$0xff]  }
  0x62   :  { %916 = vmatpush2.bf16.msra.mxu0 %v1670_v49  ;;  %v1757_v49 = vld [vmem:[#allocation5 + $0x3e0] ss:$8 sps:$4 sm:$0xff]  }
  0x63   :  { %957 = vmatpush2.bf16.msra.mxu1 %v1671_v50  ;;  %917 = vmatprep.subr.bf16.mxu0 %v1672_v52  ;;  %v1762_v50 = vld [vmem:[#allocation5 + $0x2d4] ss:$8 sps:$4 sm:$0xff]   ;;  %v1760_v52 = vld [vmem:[#allocation5 + $0x2d0] ss:$8 sps:$4 sm:$0xff]  }
  0x64   :  { %958 = vmatprep.subr.bf16.mxu1 %v1674_v53  ;;  %v1763_v53 = vld [vmem:[#allocation5 + $0x3d0] ss:$8 sps:$4 sm:$0xff]  }
  0x66   :  { %918 = vmatpush2.bf16.msra.mxu0 %v1676_v54  ;;  %v1768_v54 = vld [vmem:[#allocation5 + $0x2c4] ss:$8 sps:$4 sm:$0xff]  }
  0x67   :  { %959 = vmatpush2.bf16.msra.mxu1 %v1677_v55  ;;  %919 = vmatprep.subr.bf16.mxu0 %v1678_v56  ;;  %v1771_v55 = vld [vmem:[#allocation5 + $0x3c4] ss:$8 sps:$4 sm:$0xff]   ;;  %v1766_v56 = vld [vmem:[#allocation5 + $0x2c0] ss:$8 sps:$4 sm:$0xff]  }
  0x68   :  { %960 = vmatprep.subr.bf16.mxu1 %v1680_v57  ;;  %v1769_v57 = vld [vmem:[#allocation5 + $0x3c0] ss:$8 sps:$4 sm:$0xff]  }
  0x6a   :  { %920 = vmatpush2.bf16.msra.mxu0 %v1682_v58  ;;  %v1774_v58 = vld [vmem:[#allocation5 + $0x2b4] ss:$8 sps:$4 sm:$0xff]  }
  0x6b   :  { %961 = vmatpush2.bf16.msra.mxu1 %v1683_v59  ;;  %921 = vmatprep.subr.bf16.mxu0 %v1684_v60  ;;  %v1777_v59 = vld [vmem:[#allocation5 + $0x3b4] ss:$8 sps:$4 sm:$0xff]   ;;  %v1772_v60 = vld [vmem:[#allocation5 + $0x2b0] ss:$8 sps:$4 sm:$0xff]  }
  0x6c   :  { %962 = vmatprep.subr.bf16.mxu1 %v1686_v61  ;;  %v1775_v61 = vld [vmem:[#allocation5 + $0x3b0] ss:$8 sps:$4 sm:$0xff]  }
  0x6e   :  { %922 = vmatpush2.bf16.msra.mxu0 %v1688_v62  ;;  %v1780_v62 = vld [vmem:[#allocation5 + $0x2a4] ss:$8 sps:$4 sm:$0xff]  }
  0x6f   :  { %963 = vmatpush2.bf16.msra.mxu1 %v1689_v63  ;;  %923 = vmatprep.subr.bf16.mxu0 %v1690_v0  ;;  %v1783_v63 = vld [vmem:[#allocation5 + $0x3a4] ss:$8 sps:$4 sm:$0xff]   ;;  %v1778_v0 = vld [vmem:[#allocation5 + $0x2a0] ss:$8 sps:$4 sm:$0xff]  }
  0x70   :  { %964 = vmatprep.subr.bf16.mxu1 %v1692_v1  ;;  %v1781_v1 = vld [vmem:[#allocation5 + $0x3a0] ss:$8 sps:$4 sm:$0xff]  }
  0x72   :  { %924 = vmatpush2.bf16.msra.mxu0 %v1694_v2  ;;  %v1786_v2 = vld [vmem:[#allocation5 + $0x294] ss:$8 sps:$4 sm:$0xff]  }
  0x73   :  { %965 = vmatpush2.bf16.msra.mxu1 %v1695_v3  ;;  %975 = vmatprep.subr.bf16.mxu0 %v1702_v4  ;;  %v1789_v3 = vld [vmem:[#allocation5 + $0x394] ss:$8 sps:$4 sm:$0xff]   ;;  %v1784_v4 = vld [vmem:[#allocation5 + $0x290] ss:$8 sps:$4 sm:$0xff]  }
  0x74   :  { %1016 = vmatprep.subr.bf16.mxu1 %v1705_v5  ;;  %v1787_v5 = vld [vmem:[#allocation5 + $0x390] ss:$8 sps:$4 sm:$0xff]  }
  0x75   :  { %926 = vmatmul.mubr.bf16.vlgmr.msra.gmra.mxu0 %v1376_v6  ;;  %v1792_v6 = vld [vmem:[#allocation5 + $0x284] ss:$8 sps:$4 sm:$0xff]  }
  0x76   :  { %967 = vmatmul.mubr.bf16.vlgmr.msra.gmra.mxu1 %v1378_v7  ;;  %976 = vmatpush1.bf16.msra.mxu0 %v1700_v8  ;;  %v1795_v7 = vld [vmem:[#allocation5 + $0x384] ss:$8 sps:$4 sm:$0xff]   ;;  %v1790_v8 = vld [vmem:[#allocation5 + $0x280] ss:$8 sps:$4 sm:$0xff]  }
  0x77   :  { %1017 = vmatpush1.bf16.msra.mxu1 %v1703_v9  ;;  %977 = vmatprep.subr.bf16.mxu0 %v1708_v10  ;;  %v1793_v9 = vld [vmem:[#allocation5 + $0x380] ss:$8 sps:$4 sm:$0xff]   ;;  %v1380_v10 = vcombine.low %v1999_v34, %v1999_v34 }
  0x78   :  { %1018 = vmatprep.subr.bf16.mxu1 %v1711_v11  ;;  %1007 = vmatprep.mubr.bf16.mxu0 %v1381_v38  ;;  %v1382_v11 = vcombine.low %v2001_v35, %v2001_v35 }
  0x79   :  { %1048 = vmatprep.mubr.bf16.mxu1 %v1383_v39 }
  0x7a   :  { %978 = vmatpush1.bf16.msra.mxu0 %v1706_v12  ;;  %v1800_v12 = vld [vmem:[#allocation7 + $0x78] sm:$0xff]  }
  0x7b   :  { %1019 = vmatpush1.bf16.msra.mxu1 %v1709_v13  ;;  %979 = vmatprep.subr.bf16.mxu0 %v1714_v14  ;;  %v1801_v13 = vld [vmem:[#allocation7 + $0x38] sm:$0xff]   ;;  %v1802_v14 = vld [vmem:[#allocation7 + $0x70] sm:$0xff]  }
  0x7c   :  { %1020 = vmatprep.subr.bf16.mxu1 %v1717_v15  ;;  %v1803_v15 = vld [vmem:[#allocation7 + $0x30] sm:$0xff]  }
  0x7e   :  { %980 = vmatpush1.bf16.msra.mxu0 %v1712_v16  ;;  %v1804_v16 = vld [vmem:[#allocation7 + $0x68] sm:$0xff]  }
  0x7f   :  { %1021 = vmatpush1.bf16.msra.mxu1 %v1715_v17  ;;  %981 = vmatprep.subr.bf16.mxu0 %v1720_v18  ;;  %v1805_v17 = vld [vmem:[#allocation7 + $0x28] sm:$0xff]   ;;  %v1806_v18 = vld [vmem:[#allocation7 + $0x60] sm:$0xff]  }
  0x80   :  { %1022 = vmatprep.subr.bf16.mxu1 %v1723_v19  ;;  %v1807_v19 = vld [vmem:[#allocation7 + $0x20] sm:$0xff]  }
  0x82   :  { %982 = vmatpush1.bf16.msra.mxu0 %v1718_v20  ;;  %v1808_v20 = vld [vmem:[#allocation7 + $0x58] sm:$0xff]  }
  0x83   :  { %1023 = vmatpush1.bf16.msra.mxu1 %v1721_v21  ;;  %983 = vmatprep.subr.bf16.mxu0 %v1726_v22  ;;  %v1809_v21 = vld [vmem:[#allocation7 + $0x18] sm:$0xff]   ;;  %v1810_v22 = vld [vmem:[#allocation7 + $0x50] sm:$0xff]  }
  0x84   :  { %1024 = vmatprep.subr.bf16.mxu1 %v1729_v23  ;;  %v1811_v23 = vld [vmem:[#allocation7 + $0x10] sm:$0xff]  }
  0x86   :  { %984 = vmatpush1.bf16.msra.mxu0 %v1724_v24  ;;  %v1812_v24 = vld [vmem:[#allocation7 + $0x48] sm:$0xff]  }
  0x87   :  { %1025 = vmatpush1.bf16.msra.mxu1 %v1727_v25  ;;  %985 = vmatprep.subr.bf16.mxu0 %v1732_v26  ;;  %v1813_v25 = vld [vmem:[#allocation7 + $0x8] sm:$0xff]   ;;  %v1814_v26 = vld [vmem:[#allocation7 + $0x40] sm:$0xff]  }
  0x88   :  { %1026 = vmatprep.subr.bf16.mxu1 %v1735_v27  ;;  %v1815_v27 = vld [vmem:[#allocation7] sm:$0xff]  }
  0x8a   :  { %986 = vmatpush1.bf16.msra.mxu0 %v1730_v28  ;;  %v1816_v28 = vld [vmem:[#allocation8 + $0x38] sm:$0xff]  }
  0x8b   :  { %1027 = vmatpush1.bf16.msra.mxu1 %v1733_v29  ;;  %987 = vmatprep.subr.bf16.mxu0 %v1738_v30  ;;  %v1944_v29 = vmov 0.0   ;;  %v1817_v30 = vld [vmem:[#allocation8 + $0x30] sm:$0xff]  }
  0x8c   :  { %1028 = vmatprep.subr.bf16.mxu1 %v1741_v31  ;;  %v1818_v31 = vld [vmem:[#allocation8 + $0x28] sm:$0xff]  }
  0x8e   :  { %988 = vmatpush1.bf16.msra.mxu0 %v1736_v32  ;;  %v1819_v32 = vld [vmem:[#allocation8 + $0x20] sm:$0xff]  }
  0x8f   :  { %1029 = vmatpush1.bf16.msra.mxu1 %v1739_v33  ;;  %989 = vmatprep.subr.bf16.mxu0 %v1744_v36  ;;  %v1820_v33 = vld [vmem:[#allocation8 + $0x18] sm:$0xff]  }
  0x90   :  { %1030 = vmatprep.subr.bf16.mxu1 %v1747_v37 }
  0x92   :  { %990 = vmatpush1.bf16.msra.mxu0 %v1742_v40 }
  0x93   :  { %1031 = vmatpush1.bf16.msra.mxu1 %v1745_v41  ;;  %991 = vmatprep.subr.bf16.mxu0 %v1750_v42  ;;  %v215_v42 = vlaneseq }
  0x94   :  { %1032 = vmatprep.subr.bf16.mxu1 %v1753_v43 }
  0x95   :  { %v216_v43 = vshrl.u32 %v215_v42, 7 }
  0x96   :  { %992 = vmatpush2.bf16.msra.mxu0 %v1748_v44 }
  0x97   :  { %1033 = vmatpush2.bf16.msra.mxu1 %v1751_v45  ;;  %993 = vmatprep.subr.bf16.mxu0 %v1756_v46  ;;  %v217_v44 = vsub.s32 0, %v216_v43  ;;  %v213_v45 = vld [vmem:[%s2025_s2] sm:$0x3]  ;;  %v221_v46 = vsub.s32 1, %v216_v43 }
  0x98   :  { %1034 = vmatprep.subr.bf16.mxu1 %v1759_v47 }
  0x99   :  { %v218_v47 = vrot.slane %v213_v45, %v217_v44 }
  0x9a   :  { %994 = vmatpush2.bf16.msra.mxu0 %v1754_v48  ;;  %v222_v48 = vrot.slane %v213_v45, %v221_v46 }
  0x9b   :  { %1035 = vmatpush2.bf16.msra.mxu1 %v1757_v49  ;;  %995 = vmatprep.subr.bf16.mxu0 %v1762_v50 }
  0x9c   :  { %1036 = vmatprep.subr.bf16.mxu1 %v1765_v51 }
  0x9e   :  { %996 = vmatpush2.bf16.msra.mxu0 %v1760_v52 }
  0x9f   :  { %1037 = vmatpush2.bf16.msra.mxu1 %v1763_v53  ;;  %997 = vmatprep.subr.bf16.mxu0 %v1768_v54 }
  0xa0   :  { %1038 = vmatprep.subr.bf16.mxu1 %v1771_v55 }
  0xa2   :  { %998 = vmatpush2.bf16.msra.mxu0 %v1766_v56 }
  0xa3   :  { %1039 = vmatpush2.bf16.msra.mxu1 %v1769_v57  ;;  %999 = vmatprep.subr.bf16.mxu0 %v1774_v58 }
  0xa4   :  { %1040 = vmatprep.subr.bf16.mxu1 %v1777_v59 }
  0xa6   :  { %1000 = vmatpush2.bf16.msra.mxu0 %v1772_v60 }
  0xa7   :  { %1041 = vmatpush2.bf16.msra.mxu1 %v1775_v61  ;;  %1001 = vmatprep.subr.bf16.mxu0 %v1780_v62 }
  0xa8   :  { %1042 = vmatprep.subr.bf16.mxu1 %v1783_v63 }
  0xaa   :  { %1002 = vmatpush2.bf16.msra.mxu0 %v1778_v0 }
  0xab   :  { %1043 = vmatpush2.bf16.msra.mxu1 %v1781_v1  ;;  %1003 = vmatprep.subr.bf16.mxu0 %v1786_v2 }
  0xac   :  { %1044 = vmatprep.subr.bf16.mxu1 %v1789_v3 }
  0xae   :  { %1004 = vmatpush2.bf16.msra.mxu0 %v1784_v4 }
  0xaf   :  { %1045 = vmatpush2.bf16.msra.mxu1 %v1787_v5  ;;  %1005 = vmatprep.subr.bf16.mxu0 %v1792_v6  ;;  %v1821_v5 = vld [vmem:[#allocation8 + $0x10] sm:$0xff]   ;;  %v1822_v6 = vld [vmem:[#allocation8 + $0x8] sm:$0xff]  }
  0xb0   :  { %1046 = vmatprep.subr.bf16.mxu1 %v1795_v7  ;;  %v1823_v7 = vld [vmem:[#allocation8] sm:$0xff]  }
  0xb2   :  { %1006 = vmatpush2.bf16.msra.mxu0 %v1790_v8 }
  0xb3   :  { %1047 = vmatpush2.bf16.msra.mxu1 %v1793_v9  ;;  %1538 = vmatprep.subr.bf16.mxu0 %v1800_v12  ;;  %v1512_v9 = vld [vmem:[%s2027_s4] ss:$0 sm:$0xff]  ;;  %s1946_s4 = smov [#allocation10]  }
  0xb4   :  { %1569 = vmatprep.subr.bf16.mxu1 %v1944_v29  ;;  %s1365_s26 = sshll.u32 %s1946_s4, 4  ;;  %s1366_s26 = int_to_ptr.vmem [resolvable:$true] %s1365_s26 }
  0xb5   :  { %1008 = vmatmul.mubr.bf16.vlgmr.msra.gmra.mxu0 %v1380_v10  ;;  %p1913_p7 = scmp.lt.s32.totalorder %s1366_s26, %s1366_s26 }
  0xb6   :  { %1049 = vmatmul.mubr.bf16.vlgmr.msra.gmra.mxu1 %v1382_v11  ;;  %1539 = vmatpush3.bf16.msra.mxu0 %v1801_v13 }
  0xb7   :  { %1540 = vmatprep.subr.bf16.mxu0 %v1802_v14  ;;  %1570 = vmatpush3.bf16.msra.mxu1 %v1816_v28 }
  0xb8   :  { %1571 = vmatprep.subr.bf16.mxu1 %v1944_v29  ;;  %1585 = vmatprep.mubr.msk.bf16.mxu1 %vm1945_vm0, %v1944_v29 }
  0xba   :  { %1541 = vmatpush3.bf16.msra.mxu0 %v1803_v15 }
  0xbb   :  { %1542 = vmatprep.subr.bf16.mxu0 %v1804_v16  ;;  %1572 = vmatpush3.bf16.msra.mxu1 %v1817_v30 }
  0xbc   :  { %1573 = vmatprep.subr.bf16.mxu1 %v1944_v29 }
  0xbe   :  { %1543 = vmatpush3.bf16.msra.mxu0 %v1805_v17  ;;  %v1529_v17 = vld [vmem:[%s2029_s6] ss:$0 sm:$0xff]  ;;  %s1908_s6 = scalar_lea.vmem %s1366_s26, 128 }
  0xbf   :  { %1544 = vmatprep.subr.bf16.mxu0 %v1806_v18  ;;  %1574 = vmatpush3.bf16.msra.mxu1 %v1818_v31  ;;  %p1909_p6 = scmp.ne.s32.totalorder %s1366_s26, %s1908_s6  ;;  %p1914_p8 = scmp.lt.s32.totalorder %s1908_s6, %s1908_s6 }
  0xc0   :  { %1575 = vmatprep.subr.bf16.mxu1 %v1944_v29 }
  0xc1   :  { %p1915_p9 = por %p1914_p8, %p1913_p7 }
  0xc2   :  { %1545 = vmatpush3.bf16.msra.mxu0 %v1807_v19 }
  0xc3   :  { %1546 = vmatprep.subr.bf16.mxu0 %v1808_v20  ;;  %1576 = vmatpush3.bf16.msra.mxu1 %v1819_v32  ;;  %p1916_p10 = pnand %p1915_p9, %p1909_p6 }
  0xc4   :  { %1577 = vmatprep.subr.bf16.mxu1 %v1944_v29 }
  0xc6   :  { %1547 = vmatpush3.bf16.msra.mxu0 %v1809_v21 }
  0xc7   :  { %1548 = vmatprep.subr.bf16.mxu0 %v1810_v22  ;;  %1578 = vmatpush3.bf16.msra.mxu1 %v1820_v33 }
  0xc8   :  { %1579 = vmatprep.subr.bf16.mxu1 %v1944_v29 }
  0xca   :  { %1549 = vmatpush3.bf16.msra.mxu0 %v1811_v23 }
  0xcb   :  { %1550 = vmatprep.subr.bf16.mxu0 %v1812_v24  ;;  %1580 = vmatpush3.bf16.msra.mxu1 %v1821_v5 }
  0xcc   :  { %1581 = vmatprep.subr.bf16.mxu1 %v1944_v29 }
  0xce   :  { %1551 = vmatpush3.bf16.msra.mxu0 %v1813_v25 }
  0xcf   :  { %1552 = vmatprep.subr.bf16.mxu0 %v1814_v26  ;;  %1582 = vmatpush3.bf16.msra.mxu1 %v1822_v6 }
  0xd0   :  { %1583 = vmatprep.subr.bf16.mxu1 %v1944_v29 }
  0xd2   :  { %1553 = vmatpush3.bf16.msra.mxu0 %v1815_v27 }
  0xd3   :  { %1584 = vmatpush3.bf16.msra.mxu1 %v1823_v7 }
 0x135   :  { %v927_v34 = vpop.f32.mrf.mxu0 }
 0x136   :  { %v968_v35 = vpop.f32.mrf.mxu1  ;;  %v928_v49 = vadd.f32 %v927_v34, %v218_v47 }
 0x137   :  { %v929_v36 = vpop.f32.mrf.mxu0 }
 0x138   :  { %v970_v37 = vpop.f32.mrf.mxu1  ;;  %v930_v50 = vadd.f32 %v929_v36, %v222_v48  ;;  %v969_v51 = vadd.f32 %v968_v35, %v928_v49 }
 0x139   :  { %v931_v38 = vpop.f32.mrf.mxu0 }
 0x13a   :  { %v972_v39 = vpop.f32.mrf.mxu1  ;;  %v971_v54 = vadd.f32 %v970_v37, %v930_v50 }
 0x13b   :  { %v932_v40 = vpop.f32.mrf.mxu0 }
 0x13c   :  { %v973_v41 = vpop.f32.mrf.mxu1 }
 0x175   :  { %v1009_v52 = vpop.f32.mrf.mxu0 }
 0x176   :  { %v1050_v53 = vpop.f32.mrf.mxu1  ;;  %v1010_v55 = vadd.f32 %v1009_v52, %v969_v51 }
 0x177   :  { %v1011_v56 = vpop.f32.mrf.mxu0 }
 0x178   :  { %v1052_v57 = vpop.f32.mrf.mxu1  ;;  %v1051_v58 = vadd.f32 %v1050_v53, %v1010_v55  ;;  %v1012_v59 = vadd.f32 %v1011_v56, %v971_v54 }
 0x179   :  { %v1013_v60 = vpop.f32.mrf.mxu0 }
 0x17a   :  { %v1054_v61 = vpop.f32.mrf.mxu1  ;;  %v1053_v62 = vadd.f32 %v1052_v57, %v1012_v59  ;;  %v1057_v63 = vmax.f32 %v1051_v58, 0.0 }
 0x17b   :  { %v1014_v0 = vpop.f32.mrf.mxu0 }
 0x17c   :  { %v1055_v1 = vpop.f32.mrf.mxu1  ;;  %v1058_v2 = vmax.f32 %v1053_v62, 0.0  ;;  %v1059_v4 = vpack.c.bf16 %v1057_v63, %v1057_v63 }
 0x17e   :  { %v1060_v3 = vpack.c.bf16 %v1058_v2, %v1058_v2 }
 0x180   :  { %1228 = vmatprep.mubr.bf16.mxu0 %v1060_v3 }
 0x181   :  { %1229 = vmatmul.mubr.bf16.vlgmr.msra.gmra.mxu0 %v1059_v4 }
 0x241   :  { %v1554_v8 = vpop.f32.mrf.mxu0 }
 0x243   :  { %v1555_v10 = vpop.f32.mrf.mxu0 }
 0x244   :  { %v1556_v11 = vadd.f32 %v1555_v10, %v1554_v8 }
 0x245   :  { %v1557_v12 = vpop.f32.mrf.mxu0 }
 0x246   :  { %v1231_v13 = vadd.f32 %v1556_v11, %v1512_v9 }
 0x247   :  { %v1558_v14 = vpop.f32.mrf.mxu0 }
 0x248   :  { %v1236_v15 = vmax.f32 %v1231_v13, 0.0 }
 0x24a   :  { %v1237_v16 = vpack.c.bf16 %v1236_v15, %v1236_v15 }
 0x24c   :  { %1586 = vmatmul.mubr.bf16.vlgmr.msra.gmra.mxu1 %v1237_v16 }
 0x30c   :  { %v1343_v18 = vpop.f32.mrf.mxu1 }
 0x30d   :  { %v1344_v19 = vadd.f32 %v1529_v17, %v1343_v18 }
 0x30e   :  { %v1587_v20 = vpop.f32.mrf.mxu1 }
 0x30f   :  { %1349 = vmax.xlane.f32.xlu0 %v1344_v19 }
 0x310   :  { %v1346_v21 = vpop.f32.mrf.mxu1 }
 0x312   :  { %v1588_v22 = vpop.f32.mrf.mxu1 }
 0x398   :  { %v1350_v23 = vpop.xlane.xlu0 %1349 }
 0x399   :  { %v1351_v24 = vsub.f32 %v1344_v19, %v1350_v23 }
 0x39b   :  { %v1352_v25 = vmul.f32 1.442695, %v1351_v24 }
 0x39d   :  { %1824 = vpow2.f32 %v1352_v25 }
 0x3aa   :  { %v1825_v26 = vpop.eup %1824 }
 0x3ab   :  { %1354 = vadd.xlane.f32.xlu0 %v1825_v26 }
 0x434   :  { %v1355_v27 = vpop.xlane.xlu0 %1354 }
 0x435   :  { %1826 = vrcp.f32 %v1355_v27 }
 0x442   :  { %v1827_v28 = vpop.eup %1826 }
 0x443   :  { %v1357_v29 = vmul.f32 %v1827_v28, %v1825_v26 }
 0x445   :  { %1358 = vst [vmem:[#allocation10] sm:$0xff] %v1357_v29 }
 0x446   :  { %1919 = shalt.err (!%p1916_p10)
}
 0x447   :  { %1368 = dma.vmem_to_hbm [thread:$0]  %s1366_s26, 128, %s2030_s7, [#allocation4]  }
 0x448   :  { %1934 = dma.done.wait [#allocation4], 128  }
 0x449   :  { %1935 = vsyncadd [#allocation4], 4294967168 }
 0x44a   :  { %1372 = vsyncpa [#allocation3], 1 }
 0x44b   :  { %1373 = vsyncpa [#allocation6], 1 }
 0x44c   :  { %1374 = vsyncpa [#allocation9], 1 }
 0x44d   :  { %1375 = vsyncpa [#allocation4], 1 }

</bundles_post_ra>
